<compile_context>
chip_gen: v6e
topology: v6e:2x2x1
jax: 0.10.0
libtpu: 0.0.40
codegen_flags: <defaults>
</compile_context>

<pallas_src>
import functools

import jax
import jax.numpy as jnp
from jax.experimental import pallas as pl
from jax.experimental.pallas import tpu as pltpu

_LANES = 128


def _circle_kernel(sp_ref, sn_ref, loss_ref, gsp_ref, gsn_ref, *,
                   m, gamma, num_p, num_n):
    # Cast on load: free VPU work hidden under the EUP-bound compute.
    sp = sp_ref[...].astype(jnp.float32)      # (Rp, 128)
    sn = sn_ref[...].astype(jnp.float32)      # (Rn, 128)

    neg_inf = jnp.float32(-jnp.inf)

    def valid_mask(shape, n):
        flat = (jax.lax.broadcasted_iota(jnp.int32, shape, 0) * _LANES +
                jax.lax.broadcasted_iota(jnp.int32, shape, 1))
        return flat < n

    mask_p = valid_mask(sp.shape, num_p)
    mask_n = valid_mask(sn.shape, num_n)

    ap = jnp.maximum(-sp + (1.0 + m), 0.0)    # clamp_min(-sp + 1 + m, 0)
    an = jnp.maximum(sn + m, 0.0)             # clamp_min(sn + m, 0)
    delta_p = 1.0 - m
    delta_n = m

    # Padded elements -> -inf so exp(... - max) is exactly 0 below and the
    # max itself is unaffected.
    logit_p = jnp.where(mask_p, -ap * (sp - delta_p) * gamma, neg_inf)
    logit_n = jnp.where(mask_n, an * (sn - delta_n) * gamma, neg_inf)

    # Single exp per element (EUP is the binding unit on all generations).
    mp = jnp.max(logit_p, axis=(0, 1), keepdims=True)         # (1,1)
    mn = jnp.max(logit_n, axis=(0, 1), keepdims=True)         # (1,1)
    ep = jnp.exp(logit_p - mp)                                 # (Rp,128)
    en = jnp.exp(logit_n - mn)                                 # (Rn,128)
    sum_ep = jnp.sum(ep, axis=(0, 1), keepdims=True)           # (1,1)
    sum_en = jnp.sum(en, axis=(0, 1), keepdims=True)           # (1,1)

    # torch: log(1 + clamp_max(exp(logit_n).sum() * exp(logit_p).sum(), 1e38))
    prod = jnp.minimum((jnp.exp(mn) * sum_en) * (jnp.exp(mp) * sum_ep), 1e38)
    loss = jnp.log(1.0 + prod)                                 # (1,1)
    z = prod / (1.0 + prod)     # == 1 - exp(-loss), algebraically exact

    # Folded scalar coefficients (exact scalar reciprocal via one-elem divide).
    coef_p = (-z * gamma) / sum_ep                             # (1,1)
    coef_n = (z * gamma) / sum_en                              # (1,1)

    loss_ref[...] = loss
    gsp_ref[...] = (coef_p * ap * ep).astype(gsp_ref.dtype)
    gsn_ref[...] = (coef_n * an * en).astype(gsn_ref.dtype)


def _to_lane_tiles(x):
    """Zero-pad a 1-D vector to a multiple of 128 and reshape to (rows, 128)."""
    n = x.shape[0]
    rows = max(1, pl.cdiv(n, _LANES))
    pad = rows * _LANES - n
    if pad:
        x = jnp.pad(x, (0, pad))
    return x.reshape(rows, _LANES)


def circle_loss_backward(sp, sn, m, gamma):
    """Returns (loss, grad_sp, grad_sn) matching CircleLossBackward.forward."""
    num_p = sp.shape[0]
    num_n = sn.shape[0]
    sp2 = _to_lane_tiles(sp)
    sn2 = _to_lane_tiles(sn)
    rp = sp2.shape[0]
    rn = sn2.shape[0]

    kernel = functools.partial(_circle_kernel, m=float(m), gamma=float(gamma),
                               num_p=num_p, num_n=num_n)

    # Single-block kernel: at these sizes it is dominated by fixed per-call
    # overhead; very large N would instead tile the lane dimension with a real
    # grid and an online logsumexp (esp. on v7x's 64 MiB VMEM).
    loss, gsp, gsn = pl.pallas_call(
        kernel,
        out_shape=(
            jax.ShapeDtypeStruct((1, 1), jnp.float32),
            jax.ShapeDtypeStruct((rp, _LANES), jnp.float32),
            jax.ShapeDtypeStruct((rn, _LANES), jnp.float32),
        ),
        grid=(1,),
        in_specs=[
            pl.BlockSpec((rp, _LANES), lambda i: (0, 0)),
            pl.BlockSpec((rn, _LANES), lambda i: (0, 0)),
        ],
        out_specs=(
            pl.BlockSpec((1, 1), lambda i: (0, 0)),
            pl.BlockSpec((rp, _LANES), lambda i: (0, 0)),
            pl.BlockSpec((rn, _LANES), lambda i: (0, 0)),
        ),
        compiler_params=pltpu.CompilerParams(
            dimension_semantics=("arbitrary",)),
    )(sp2, sn2)

    return (loss[0, 0],
            gsp.reshape(-1)[:num_p],
            gsn.reshape(-1)[:num_n])


def _reference(sp, sn, m, gamma):
    """Plain-JAX reference mirroring the PyTorch module."""
    ap = jnp.maximum(-sp + 1.0 + m, 0.0)
    an = jnp.maximum(sn + m, 0.0)
    logit_p = -ap * (sp - (1.0 - m)) * gamma
    logit_n = an * (sn - m) * gamma
    loss = jnp.log(1.0 + jnp.minimum(jnp.sum(jnp.exp(logit_n)) *
                                     jnp.sum(jnp.exp(logit_p)), 1e38))
    z = 1.0 - jnp.exp(-loss)
    gsp = z * (-ap) * jax.nn.softmax(logit_p) * gamma
    gsn = z * an * jax.nn.softmax(logit_n) * gamma
    return loss, gsp, gsn


if __name__ == "__main__":
    m = 0.25
    gamma = 32.0

    key = jax.random.PRNGKey(0)
    kp, kn = jax.random.split(key)
    # cosine-similarity-like inputs in [0, 1); sizes exercise both the padded
    # (200 -> 2x128 with 56 padded lanes) and exact-multiple (384 -> 3x128)
    # lane-dense layouts.
    sp = jax.random.uniform(kp, (200,), dtype=jnp.float32)    # positive sims
    sn = jax.random.uniform(kn, (384,), dtype=jnp.float32)    # negative sims

    loss, grad_sp, grad_sn = circle_loss_backward(sp, sn, m, gamma)
    jax.block_until_ready((loss, grad_sp, grad_sn))

    ref_loss, ref_gsp, ref_gsn = _reference(sp, sn, m, gamma)
    assert jnp.allclose(loss, ref_loss, rtol=1e-5, atol=1e-5)
    assert jnp.allclose(grad_sp, ref_gsp, rtol=1e-5, atol=1e-6)
    assert jnp.allclose(grad_sn, ref_gsn, rtol=1e-5, atol=1e-6)

    print("KERNEL_OK")
</pallas_src>

<mosaic_0001>
module attributes {stable_mosaic.version = 11 : i64} {
  func.func @_circle_kernel(%arg0: i32, %arg1: memref<2x128xf32, #tpu.memory_space<vmem>>, %arg2: memref<3x128xf32, #tpu.memory_space<vmem>>, %arg3: memref<1x1xf32, #tpu.memory_space<vmem>>, %arg4: memref<2x128xf32, #tpu.memory_space<vmem>>, %arg5: memref<3x128xf32, #tpu.memory_space<vmem>>) attributes {dimension_semantics = [#tpu.dimension_semantics<arbitrary>], iteration_bounds = array<i64: 1>, scalar_prefetch = 0 : i64, scratch_operands = 0 : i64, tpu.core_type = #tpu.core_type<tc>, window_params = [{pipeline_mode = #tpu.pipeline_mode<synchronous>, transform_indices = @transform_0, window_bounds = array<i64: 2, 128>}, {pipeline_mode = #tpu.pipeline_mode<synchronous>, transform_indices = @transform_1, window_bounds = array<i64: 3, 128>}, {pipeline_mode = #tpu.pipeline_mode<synchronous>, transform_indices = @transform_2, window_bounds = array<i64: 1, 1>}, {pipeline_mode = #tpu.pipeline_mode<synchronous>, transform_indices = @transform_3, window_bounds = array<i64: 2, 128>}, {pipeline_mode = #tpu.pipeline_mode<synchronous>, transform_indices = @transform_4, window_bounds = array<i64: 3, 128>}]} {
    %c0 = arith.constant 0 : index
    %c0_0 = arith.constant 0 : index
    %0 = vector.load %arg1[%c0, %c0_0] : memref<2x128xf32, #tpu.memory_space<vmem>>, vector<2x128xf32>
    %c0_1 = arith.constant 0 : index
    %c0_2 = arith.constant 0 : index
    %1 = vector.load %arg2[%c0_1, %c0_2] : memref<3x128xf32, #tpu.memory_space<vmem>>, vector<3x128xf32>
    %2 = tpu.iota {dimensions = array<i32: 0>} : vector<2x128xi32>
    %c128_i32 = arith.constant 128 : i32
    %3 = vector.broadcast %c128_i32 : i32 to vector<2x128xi32>
    %4 = arith.muli %2, %3 : vector<2x128xi32>
    %5 = tpu.iota {dimensions = array<i32: 1>} : vector<2x128xi32>
    %6 = arith.addi %4, %5 : vector<2x128xi32>
    %c200_i32 = arith.constant 200 : i32
    %7 = vector.broadcast %c200_i32 : i32 to vector<2x128xi32>
    %8 = arith.cmpi slt, %6, %7 : vector<2x128xi32>
    %9 = tpu.iota {dimensions = array<i32: 0>} : vector<3x128xi32>
    %c128_i32_3 = arith.constant 128 : i32
    %10 = vector.broadcast %c128_i32_3 : i32 to vector<3x128xi32>
    %11 = arith.muli %9, %10 : vector<3x128xi32>
    %12 = tpu.iota {dimensions = array<i32: 1>} : vector<3x128xi32>
    %13 = arith.addi %11, %12 : vector<3x128xi32>
    %c384_i32 = arith.constant 384 : i32
    %14 = vector.broadcast %c384_i32 : i32 to vector<3x128xi32>
    %15 = arith.cmpi slt, %13, %14 : vector<3x128xi32>
    %cst = arith.constant 0.000000e+00 : f32
    %16 = vector.broadcast %cst : f32 to vector<2x128xf32>
    %17 = arith.subf %16, %0 : vector<2x128xf32>
    %cst_4 = arith.constant 1.250000e+00 : f32
    %18 = vector.broadcast %cst_4 : f32 to vector<2x128xf32>
    %19 = arith.addf %17, %18 : vector<2x128xf32>
    %cst_5 = arith.constant 0.000000e+00 : f32
    %20 = vector.broadcast %cst_5 : f32 to vector<2x128xf32>
    %21 = arith.maximumf %19, %20 : vector<2x128xf32>
    %cst_6 = arith.constant 2.500000e-01 : f32
    %22 = vector.broadcast %cst_6 : f32 to vector<3x128xf32>
    %23 = arith.addf %1, %22 : vector<3x128xf32>
    %cst_7 = arith.constant 0.000000e+00 : f32
    %24 = vector.broadcast %cst_7 : f32 to vector<3x128xf32>
    %25 = arith.maximumf %23, %24 : vector<3x128xf32>
    %cst_8 = arith.constant 0.000000e+00 : f32
    %26 = vector.broadcast %cst_8 : f32 to vector<2x128xf32>
    %27 = arith.subf %26, %21 : vector<2x128xf32>
    %cst_9 = arith.constant 7.500000e-01 : f32
    %28 = vector.broadcast %cst_9 : f32 to vector<2x128xf32>
    %29 = arith.subf %0, %28 : vector<2x128xf32>
    %30 = arith.mulf %27, %29 : vector<2x128xf32>
    %cst_10 = arith.constant 3.200000e+01 : f32
    %31 = vector.broadcast %cst_10 : f32 to vector<2x128xf32>
    %32 = arith.mulf %30, %31 : vector<2x128xf32>
    %cst_11 = arith.constant 0xFF800000 : f32
    %33 = vector.broadcast %cst_11 : f32 to vector<2x128xf32>
    %34 = arith.select %8, %32, %33 : vector<2x128xi1>, vector<2x128xf32>
    %cst_12 = arith.constant 2.500000e-01 : f32
    %35 = vector.broadcast %cst_12 : f32 to vector<3x128xf32>
    %36 = arith.subf %1, %35 : vector<3x128xf32>
    %37 = arith.mulf %25, %36 : vector<3x128xf32>
    %cst_13 = arith.constant 3.200000e+01 : f32
    %38 = vector.broadcast %cst_13 : f32 to vector<3x128xf32>
    %39 = arith.mulf %37, %38 : vector<3x128xf32>
    %cst_14 = arith.constant 0xFF800000 : f32
    %40 = vector.broadcast %cst_14 : f32 to vector<3x128xf32>
    %41 = arith.select %15, %39, %40 : vector<3x128xi1>, vector<3x128xf32>
    %42 = vector.shape_cast %34 : vector<2x128xf32> to vector<1x2x128xf32>
    %cst_15 = arith.constant dense<0xFF800000> : vector<1xf32>
    %43 = vector.multi_reduction <maximumf>, %42, %cst_15 [1, 2] : vector<1x2x128xf32> to vector<1xf32>
    %44 = vector.shape_cast %43 : vector<1xf32> to vector<1x1x1xf32>
    %45 = vector.extract %44[0, 0, 0] : f32 from vector<1x1x1xf32>
    %46 = vector.broadcast %45 : f32 to vector<1x1xf32>
    %47 = vector.shape_cast %41 : vector<3x128xf32> to vector<1x3x128xf32>
    %cst_16 = arith.constant dense<0xFF800000> : vector<1xf32>
    %48 = vector.multi_reduction <maximumf>, %47, %cst_16 [1, 2] : vector<1x3x128xf32> to vector<1xf32>
    %49 = vector.shape_cast %48 : vector<1xf32> to vector<1x1x1xf32>
    %50 = vector.extract %49[0, 0, 0] : f32 from vector<1x1x1xf32>
    %51 = vector.broadcast %50 : f32 to vector<1x1xf32>
    %52 = vector.broadcast %46 : vector<1x1xf32> to vector<2x128xf32>
    %53 = arith.subf %34, %52 : vector<2x128xf32>
    %54 = math.exp %53 : vector<2x128xf32>
    %55 = vector.broadcast %51 : vector<1x1xf32> to vector<3x128xf32>
    %56 = arith.subf %41, %55 : vector<3x128xf32>
    %57 = math.exp %56 : vector<3x128xf32>
    %58 = vector.shape_cast %54 : vector<2x128xf32> to vector<1x2x128xf32>
    %cst_17 = arith.constant dense<0.000000e+00> : vector<1xf32>
    %59 = vector.multi_reduction <add>, %58, %cst_17 [1, 2] : vector<1x2x128xf32> to vector<1xf32>
    %60 = vector.shape_cast %59 : vector<1xf32> to vector<1x1x1xf32>
    %61 = vector.extract %60[0, 0, 0] : f32 from vector<1x1x1xf32>
    %62 = vector.broadcast %61 : f32 to vector<1x1xf32>
    %63 = vector.shape_cast %57 : vector<3x128xf32> to vector<1x3x128xf32>
    %cst_18 = arith.constant dense<0.000000e+00> : vector<1xf32>
    %64 = vector.multi_reduction <add>, %63, %cst_18 [1, 2] : vector<1x3x128xf32> to vector<1xf32>
    %65 = vector.shape_cast %64 : vector<1xf32> to vector<1x1x1xf32>
    %66 = vector.extract %65[0, 0, 0] : f32 from vector<1x1x1xf32>
    %67 = vector.broadcast %66 : f32 to vector<1x1xf32>
    %68 = math.exp %51 : vector<1x1xf32>
    %69 = arith.mulf %68, %67 : vector<1x1xf32>
    %70 = math.exp %46 : vector<1x1xf32>
    %71 = arith.mulf %70, %62 : vector<1x1xf32>
    %72 = arith.mulf %69, %71 : vector<1x1xf32>
    %cst_19 = arith.constant 9.99999968E+37 : f32
    %73 = vector.broadcast %cst_19 : f32 to vector<1x1xf32>
    %74 = arith.minimumf %72, %73 : vector<1x1xf32>
    %cst_20 = arith.constant 1.000000e+00 : f32
    %75 = vector.broadcast %cst_20 : f32 to vector<1x1xf32>
    %76 = arith.addf %75, %74 : vector<1x1xf32>
    %77 = math.log %76 : vector<1x1xf32>
    %cst_21 = arith.constant 1.000000e+00 : f32
    %78 = vector.broadcast %cst_21 : f32 to vector<1x1xf32>
    %79 = arith.addf %78, %74 : vector<1x1xf32>
    %80 = arith.divf %74, %79 : vector<1x1xf32>
    %cst_22 = arith.constant 0.000000e+00 : f32
    %81 = vector.broadcast %cst_22 : f32 to vector<1x1xf32>
    %82 = arith.subf %81, %80 : vector<1x1xf32>
    %cst_23 = arith.constant 3.200000e+01 : f32
    %83 = vector.broadcast %cst_23 : f32 to vector<1x1xf32>
    %84 = arith.mulf %82, %83 : vector<1x1xf32>
    %85 = arith.divf %84, %62 : vector<1x1xf32>
    %cst_24 = arith.constant 3.200000e+01 : f32
    %86 = vector.broadcast %cst_24 : f32 to vector<1x1xf32>
    %87 = arith.mulf %80, %86 : vector<1x1xf32>
    %88 = arith.divf %87, %67 : vector<1x1xf32>
    %c0_25 = arith.constant 0 : index
    %c0_26 = arith.constant 0 : index
    %89 = vector.load %arg3[%c0_25, %c0_26] : memref<1x1xf32, #tpu.memory_space<vmem>>, vector<1x1xf32>
    tpu.vector_store %arg3[%c0_25, %c0_26], %77 {strides = array<i32>} : memref<1x1xf32, #tpu.memory_space<vmem>>, vector<1x1xf32>,
    %90 = vector.broadcast %85 : vector<1x1xf32> to vector<2x128xf32>
    %91 = arith.mulf %90, %21 : vector<2x128xf32>
    %92 = arith.mulf %91, %54 : vector<2x128xf32>
    %c0_27 = arith.constant 0 : index
    %c0_28 = arith.constant 0 : index
    %93 = vector.load %arg4[%c0_27, %c0_28] : memref<2x128xf32, #tpu.memory_space<vmem>>, vector<2x128xf32>
    tpu.vector_store %arg4[%c0_27, %c0_28], %92 {strides = array<i32>} : memref<2x128xf32, #tpu.memory_space<vmem>>, vector<2x128xf32>,
    %94 = vector.broadcast %88 : vector<1x1xf32> to vector<3x128xf32>
    %95 = arith.mulf %94, %25 : vector<3x128xf32>
    %96 = arith.mulf %95, %57 : vector<3x128xf32>
    %c0_29 = arith.constant 0 : index
    %c0_30 = arith.constant 0 : index
    %97 = vector.load %arg5[%c0_29, %c0_30] : memref<3x128xf32, #tpu.memory_space<vmem>>, vector<3x128xf32>
    tpu.vector_store %arg5[%c0_29, %c0_30], %96 {strides = array<i32>} : memref<3x128xf32, #tpu.memory_space<vmem>>, vector<3x128xf32>,
    return
  }
  func.func @transform_0(%arg0: i32) -> (i32, i32) {
    %c0_i32 = arith.constant 0 : i32
    %c0_i32_0 = arith.constant 0 : i32
    %c0_i32_1 = arith.constant 0 : i32
    return %c0_i32, %c0_i32_0 : i32, i32
  }
  func.func @transform_1(%arg0: i32) -> (i32, i32) {
    %c0_i32 = arith.constant 0 : i32
    %c0_i32_0 = arith.constant 0 : i32
    %c0_i32_1 = arith.constant 0 : i32
    return %c0_i32, %c0_i32_0 : i32, i32
  }
  func.func @transform_2(%arg0: i32) -> (i32, i32) {
    %c0_i32 = arith.constant 0 : i32
    %c0_i32_0 = arith.constant 0 : i32
    %c0_i32_1 = arith.constant 0 : i32
    return %c0_i32, %c0_i32_0 : i32, i32
  }
  func.func @transform_3(%arg0: i32) -> (i32, i32) {
    %c0_i32 = arith.constant 0 : i32
    %c0_i32_0 = arith.constant 0 : i32
    %c0_i32_1 = arith.constant 0 : i32
    return %c0_i32, %c0_i32_0 : i32, i32
  }
  func.func @transform_4(%arg0: i32) -> (i32, i32) {
    %c0_i32 = arith.constant 0 : i32
    %c0_i32_0 = arith.constant 0 : i32
    %c0_i32_1 = arith.constant 0 : i32
    return %c0_i32, %c0_i32_0 : i32, i32
  }
}

</mosaic_0001>

<bundles_post_ra>
// kernel: tpu_custom_call.1
= control target key start
LH: loop header
LB: loop body
LE: loop exit
PB: predicated region body
PF: predicated region fallthrough
CT: control target
= control target key end

     0   :  { %10 = vsyncpa [#allocation3], 0  ;;  %s400_s0 = inlined_call_operand.hbm [shape: f32[2,128], index: 0, kind: input, shape index: {}]   ;;  %s401_s1 = inlined_call_operand.hbm [shape: f32[3,128], index: 1, kind: input, shape index: {}]   ;;  %s402_s2 = inlined_call_operand.hbm [shape: f32[1,1], index: 2, kind: output, shape index: {0}]   ;;  %s403_s3 = inlined_call_operand.hbm [shape: f32[2,128], index: 3, kind: output, shape index: {1}]   ;;  %s404_s4 = inlined_call_operand.hbm [shape: f32[3,128], index: 4, kind: output, shape index: {2}]  }
   0x1   :  { %11 = vsyncpa [#allocation6], 0 }
   0x2   :  { %12 = vsyncpa [#allocation4], 0 }
   0x3   :  { %13 = vsyncpa [#allocation9], 0  ;;  %s326_s15 = smov [#allocation2]   ;;  %s327_s17 = smov [#allocation5]  }
   0x4   :  { %s20_s16 = sshll.u32 %s326_s15, 4  ;;  %s30_s18 = sshll.u32 %s327_s17, 4  ;;  %s21_s16 = int_to_ptr.vmem [resolvable:$true] %s20_s16  ;;  %s31_s18 = int_to_ptr.vmem [resolvable:$true] %s30_s18 }
   0x5   :  { %s226_s19 = scalar_lea.vmem %s21_s16, 32  ;;  %p231_p1 = scmp.lt.s32.totalorder %s21_s16, %s21_s16 }
   0x6   :  { %p227_p0 = scmp.ne.s32.totalorder %s21_s16, %s226_s19  ;;  %p232_p2 = scmp.lt.s32.totalorder %s226_s19, %s226_s19 }
   0x8   :  { %p233_p3 = por %p232_p2, %p231_p1 }
   0xa   :  { %p234_p4 = pnand %p233_p3, %p227_p0 }
   0xc   :  { %237 = shalt.err (!%p234_p4)
}
   0xd   :  { %23 = dma.hbm_to_vmem [thread:$0]  %s400_s0, 32, %s21_s16, [#allocation3]  }
   0xe   :  { %s246_s22 = scalar_lea.vmem %s31_s18, 64  ;;  %p251_p6 = scmp.lt.s32.totalorder %s31_s18, %s31_s18 }
   0xf   :  { %p247_p5 = scmp.ne.s32.totalorder %s31_s18, %s246_s22  ;;  %p252_p7 = scmp.lt.s32.totalorder %s246_s22, %s246_s22 }
  0x11   :  { %p253_p8 = por %p252_p7, %p251_p6 }
  0x13   :  { %p254_p9 = pnand %p253_p8, %p247_p5 }
  0x15   :  { %257 = shalt.err (!%p254_p9)
}
  0x16   :  { %33 = dma.hbm_to_vmem [thread:$0]  %s401_s1, 64, %s31_s18, [#allocation6]  }
  0x17   :  { %318 = dma.done.wait [#allocation3], 32  }
  0x18   :  { %319 = vsyncadd [#allocation3], 4294967264 }
  0x19   :  { %320 = dma.done.wait [#allocation6], 64  }
  0x1a   :  { %321 = vsyncadd [#allocation6], 4294967232  ;;  %v42_v0 = vlaneseq  ;;  %v40_v2 = vld [vmem:[#allocation2] sm:$0x3]  ;;  %v41_v3 = vld [vmem:[#allocation5] sm:$0x7] }
  0x1b   :  { %v50_v4 = vsub.f32 0.0, %v40_v2  ;;  %v362_v7 = vadd.f32 0.25, %v41_v3  ;;  %v188_v8 = vadd.f32 -0.25, %v41_v3  ;;  %v187_v12 = vadd.f32 -0.75, %v40_v2  ;;  %s328_s27 = smov [#allocation7]  }
  0x1c   :  { %v43_v1 = vshrl.u32 %v42_v0, 7  ;;  %v46_v6 = vand.u32 127, %v42_v0  ;;  %vm64_vm2 = vcmask 1041408   ;;  %vm76_vm3 = vcmask 1042432   ;;  %s150_s28 = sshll.u32 %s328_s27, 4  ;;  %s151_s28 = int_to_ptr.vmem [resolvable:$true] %s150_s28 }
  0x1d   :  { %v364_v9 = vadd.f32 1.25, %v50_v4  ;;  %v54_v10 = vmax.f32 %v362_v7, 0.0  ;;  %vm136_vm4 = vcmask 0   ;;  %s258_s29 = scalar_lea.vmem %s151_s28, 16  ;;  %s262_s30 = scalar_lea.vmem %s151_s28, 32 }
  0x1e   :  { %v44_v5 = vmul.u32 128, %v43_v1  ;;  %p259_p10 = scmp.ne.s32.totalorder %s151_s28, %s258_s29  ;;  %p263_p11 = scmp.lt.s32.totalorder %s151_s28, %s151_s28 }
  0x1f   :  { %v52_v11 = vmax.f32 %v364_v9, 0.0  ;;  %v61_v14 = vmul.f32 %v188_v8, %v54_v10  ;;  %p264_p12 = scmp.lt.s32.totalorder %s262_s30, %s258_s29 }
  0x20   :  { %v47_v13 = vadd.s32 %v46_v6, %v44_v5 }
  0x21   :  { %v55_v15 = vsub.f32 0.0, %v52_v11  ;;  %v62_v17 = vmul.f32 32.0, %v61_v14  ;;  %p265_p13 = por %p264_p12, %p263_p11 }
  0x22   :  { %vm48_vm0 = vcmp.lt.s32.totalorder %v47_v13, 200  ;;  %vm49_vm1 = vcmp.lt.s32.totalorder %v47_v13, 384 }
  0x23   :  { %v57_v16 = vmul.f32 %v187_v12, %v55_v15  ;;  %v63_v20 = vsel %vm49_vm1, %v62_v17, -inf  ;;  %p266_p0 = pnand %p265_p13, %p259_p10 }
  0x24   :  { %v77_v22 = vsel %vm76_vm3, %v63_v20, -inf }
  0x25   :  { %v58_v18 = vmul.f32 32.0, %v57_v16 }
  0x27   :  { %v59_v19 = vsel %vm48_vm0, %v58_v18, -inf }
  0x28   :  { %v65_v21 = vsel %vm64_vm2, %v59_v19, -inf }
  0x29   :  { %66 = vmax.xlane.f32.xlu0 %v65_v21 }
  0x2d   :  { %78 = vmax.xlane.f32.xlu0 %v77_v22 }
  0xb2   :  { %v67_v23 = vpop.xlane.xlu0 %66 }
  0xb3   :  { %v68_v24 = vrot.slane %v67_v23, 4 }
  0xb5   :  { %v69_v25 = vmax.f32 %v67_v23, %v68_v24 }
  0xb6   :  { %v79_v26 = vpop.xlane.xlu0 %78 }
  0xb7   :  { %v70_v27 = vrot.slane %v69_v25, 2  ;;  %v80_v28 = vrot.slane %v79_v26, 4 }
  0xb9   :  { %v81_v29 = vmax.f32 %v79_v26, %v80_v28  ;;  %v71_v30 = vmax.f32 %v69_v25, %v70_v27 }
  0xbb   :  { %v82_v31 = vrot.slane %v81_v29, 2  ;;  %v72_v32 = vrot.slane %v71_v30, 1 }
  0xbd   :  { %v83_v33 = vmax.f32 %v81_v29, %v82_v31  ;;  %v73_v34 = vmax.f32 %v71_v30, %v72_v32 }
  0xbf   :  { %189 = vpush %v73_v34  ;;  %v84_v35 = vrot.slane %v83_v33, 1 }
  0xc1   :  { %v85_v36 = vmax.f32 %v83_v33, %v84_v35 }
  0xc3   :  { %191 = vpush %v85_v36 }
  0xf0   :  { %s374_s0 = spop %189 }
  0xf1   :  { %v75_v37 = vstv %s374_s0 }
  0xf2   :  { %v88_v38 = vsub.f32 %v59_v19, %v75_v37  ;;  %v119_v61 = vmul.f32 1.442695, %v75_v37 }
  0xf4   :  { %v89_v39 = vmul.f32 1.442695, %v88_v38  ;;  %s192_s1 = spop %191 }
  0xf5   :  { %v87_v40 = vstv %s192_s1 }
  0xf6   :  { %202 = vpow2.f32 %v89_v39  ;;  %v91_v41 = vsub.f32 %v63_v20, %v87_v40  ;;  %v116_v62 = vmul.f32 1.442695, %v87_v40 }
  0xf8   :  { %v92_v42 = vmul.f32 1.442695, %v91_v41 }
  0xfa   :  { %204 = vpow2.f32 %v92_v42 }
  0xfb   :  { %206 = vpow2.f32 %v119_v61 }
  0xfc   :  { %208 = vpow2.f32 %v116_v62 }
 0x103   :  { %v377_v43 = vpop.eup %202 }
 0x104   :  { %v94_v44 = vsel %vm64_vm2, %v377_v43, 0.0 }
 0x105   :  { %95 = vadd.xlane.f32.xlu1 %v94_v44 }
 0x107   :  { %v381_v45 = vpop.eup %204 }
 0x108   :  { %v105_v46 = vsel %vm76_vm3, %v381_v45, 0.0  ;;  %v207_v0 = vpop.eup %206 }
 0x109   :  { %106 = vadd.xlane.f32.xlu1 %v105_v46  ;;  %v209_v1 = vpop.eup %208 }
 0x18e   :  { %v96_v47 = vpop.xlane.xlu1 %95 }
 0x18f   :  { %v97_v48 = vrot.slane %v96_v47, 4 }
 0x191   :  { %v98_v49 = vadd.f32 %v97_v48, %v96_v47 }
 0x192   :  { %v107_v50 = vpop.xlane.xlu1 %106 }
 0x193   :  { %v99_v51 = vrot.slane %v98_v49, 2  ;;  %v108_v52 = vrot.slane %v107_v50, 4 }
 0x195   :  { %v109_v53 = vadd.f32 %v108_v52, %v107_v50  ;;  %v100_v54 = vadd.f32 %v99_v51, %v98_v49 }
 0x197   :  { %v110_v55 = vrot.slane %v109_v53, 2  ;;  %v101_v56 = vrot.slane %v100_v54, 1 }
 0x199   :  { %v111_v57 = vadd.f32 %v110_v55, %v109_v53  ;;  %v102_v58 = vadd.f32 %v101_v56, %v100_v54 }
 0x19b   :  { %193 = vpush %v102_v58  ;;  %v112_v59 = vrot.slane %v111_v57, 1 }
 0x19d   :  { %v113_v60 = vadd.f32 %v112_v59, %v111_v57 }
 0x19f   :  { %195 = vpush %v113_v60 }
 0x1cc   :  { %s194_s25 = spop %193 }
 0x1cd   :  { %v104_v63 = vstv %s194_s25 }
 0x1ce   :  { %v121_v3 = vmul.f32 %v207_v0, %v104_v63 }
 0x1d0   :  { %s196_s26 = spop %195 }
 0x1d1   :  { %v115_v2 = vstv %s196_s26 }
 0x1d2   :  { %v118_v4 = vmul.f32 %v209_v1, %v115_v2 }
 0x1d4   :  { %v122_v5 = vmul.f32 %v121_v3, %v118_v4 }
 0x1d6   :  { %v123_v6 = vmin.f32 %v122_v5, 1e+38 }
 0x1d8   :  { %v124_v8 = vadd.f32 1.0, %v123_v6 }
 0x1da   :  { %210 = vlog2.f32 %v124_v8 }
 0x1db   :  { %212 = vrcp.f32 %v124_v8 }
 0x1dc   :  { %214 = vrcp.f32 %v115_v2 }
 0x1dd   :  { %216 = vrcp.f32 %v104_v63 }
 0x1e7   :  { %v211_v12 = vpop.eup %210 }
 0x1e8   :  { %v213_v13 = vpop.eup %212  ;;  %v126_v14 = vmul.f32 0.6931472, %v211_v12 }
 0x1e9   :  { %v128_v15 = vmul.f32 %v213_v13, %v123_v6 }
 0x1ea   :  { %137 = vst.msk [vmem:[#allocation7] sm:$0x1] %vm136_vm4, %v126_v14 }
 0x1eb   :  { %v129_v16 = vsub.f32 0.0, %v128_v15  ;;  %v133_v17 = vmul.f32 32.0, %v128_v15 }
 0x1ec   :  { %269 = shalt.err (!%p266_p0)
}
 0x1ed   :  { %153 = dma.vmem_to_hbm [thread:$0]  %s151_s28, 16, %s402_s2, [#allocation4]   ;;  %v215_v18 = vpop.eup %214  ;;  %v130_v19 = vmul.f32 32.0, %v129_v16 }
 0x1ee   :  { %v135_v20 = vmul.f32 %v215_v18, %v133_v17  ;;  %v217_v21 = vpop.eup %216  ;;  %s329_s7 = smov [#allocation8]   ;;  %s330_s9 = smov [#allocation10]  }
 0x1ef   :  { %v132_v22 = vmul.f32 %v217_v21, %v130_v19  ;;  %s160_s8 = sshll.u32 %s329_s7, 4  ;;  %s170_s10 = sshll.u32 %s330_s9, 4  ;;  %s161_s8 = int_to_ptr.vmem [resolvable:$true] %s160_s8  ;;  %s171_s10 = int_to_ptr.vmem [resolvable:$true] %s170_s10 }
 0x1f0   :  { %v141_v23 = vmul.f32 %v135_v20, %v54_v10  ;;  %s278_s2 = scalar_lea.vmem %s161_s8, 32  ;;  %p283_p2 = scmp.lt.s32.totalorder %s161_s8, %s161_s8 }
 0x1f1   :  { %v138_v24 = vmul.f32 %v132_v22, %v52_v11  ;;  %p279_p1 = scmp.ne.s32.totalorder %s161_s8, %s278_s2  ;;  %p284_p3 = scmp.lt.s32.totalorder %s278_s2, %s278_s2 }
 0x1f2   :  { %v142_v25 = vmul.f32 %v381_v45, %v141_v23 }
 0x1f3   :  { %v139_v26 = vmul.f32 %v377_v43, %v138_v24  ;;  %p285_p4 = por %p284_p3, %p283_p2 }
 0x1f4   :  { %143 = vst [vmem:[#allocation10] sm:$0x7] %v142_v25 }
 0x1f5   :  { %140 = vst [vmem:[#allocation8] sm:$0x3] %v139_v26  ;;  %p286_p5 = pnand %p285_p4, %p279_p1 }
 0x1f7   :  { %289 = shalt.err (!%p286_p5)
}
 0x1f8   :  { %163 = dma.vmem_to_hbm [thread:$0]  %s161_s8, 32, %s403_s3, [#allocation9]  }
 0x1f9   :  { %s298_s13 = scalar_lea.vmem %s171_s10, 64  ;;  %p303_p7 = scmp.lt.s32.totalorder %s171_s10, %s171_s10 }
 0x1fa   :  { %p299_p6 = scmp.ne.s32.totalorder %s171_s10, %s298_s13  ;;  %p304_p8 = scmp.lt.s32.totalorder %s298_s13, %s298_s13 }
 0x1fc   :  { %p305_p9 = por %p304_p8, %p303_p7 }
 0x1fe   :  { %p306_p10 = pnand %p305_p9, %p299_p6 }
 0x200   :  { %309 = shalt.err (!%p306_p10)
}
 0x201   :  { %173 = dma.vmem_to_hbm [thread:$0]  %s171_s10, 64, %s404_s4, [#allocation9]  }
 0x202   :  { %322 = dma.done.wait [#allocation4], 16  }
 0x203   :  { %323 = vsyncadd [#allocation4], 4294967280 }
 0x204   :  { %324 = dma.done.wait [#allocation9], 96  }
 0x205   :  { %325 = vsyncadd [#allocation9], 4294967200 }
 0x206   :  { %183 = vsyncpa [#allocation3], 1 }
 0x207   :  { %184 = vsyncpa [#allocation6], 1 }
 0x208   :  { %185 = vsyncpa [#allocation4], 1 }
 0x209   :  { %186 = vsyncpa [#allocation9], 1 }

</bundles_post_ra>
